<compile_context>
chip_gen: v7x
topology: tpu7x:2x2x1
jax: 0.10.0
libtpu: 0.0.40
codegen_flags: <defaults>
</compile_context>

<pallas_src>
import functools
import math

import jax
import jax.numpy as jnp
import numpy as np
from jax.experimental import pallas as pl
from jax.experimental.pallas import tpu as pltpu


# ---------------------------------------------------------------------------
# Generation-aware VMEM sizing
# ---------------------------------------------------------------------------
_VMEM_SIZES = None


def _vmem_budget_limit():
    """(tile-picking budget, vmem_limit_bytes) derived from VMEM capacity."""
    global _VMEM_SIZES
    if _VMEM_SIZES is None:
        cap = 64 * 1024 * 1024                      # conservative fallback (v7x)
        try:
            cap = int(pltpu.get_tpu_info().vmem_capacity_bytes) or cap
        except Exception:
            pass
        budget = max(int(cap * 0.35), 8 * 1024 * 1024)   # working-set target
        limit = min(max(int(cap * 0.85), budget + 4 * 1024 * 1024), cap)
        _VMEM_SIZES = (budget, limit)
    return _VMEM_SIZES


def _round_up(x, m):
    return ((x + m - 1) // m) * m


def _round_down(x, m):
    return (x // m) * m


# ---------------------------------------------------------------------------
# Kernel 1: lane-dense broadcast-add of a periodic per-channel bias onto
# k_out.  Used by both 'learnable' and 'sine' (their forward is exactly
# "add a bias that depends only on (channel, kh, kw)").
# ---------------------------------------------------------------------------
def _bias_add_kernel(x_ref, b_ref, o_ref):
    # x_ref: (Bt, C, Lt), b_ref: (C, Lt) -> broadcast over the batch dim.
    o_ref[...] = x_ref[...] + b_ref[...]


def _pick_bias_tiles(B, C, L, period, itemsize, budget_bytes):
    """Pick (Bt, Lt).  Lt is a multiple of lcm(period, 128) or == L."""
    c_pad = _round_up(max(C, 1), 8)
    gran = period * 128 // math.gcd(period, 128)          # lcm(period, 128)
    # Per lane of Lt (Bt = 1): x + out double-buffered (4x) plus the resident
    # bias slab's default double buffer (2x).
    per_lane = (4 + 2) * c_pad * itemsize
    lt = _round_down(max(budget_bytes // per_lane, gran), gran)
    bt = 1
    if lt >= L:
        lt = L
        if B == 1 and L >= 2 * gran:
            # v7x: keep >= 2 lane tiles so both TensorCores get work.
            lt = max(_round_down((L + 1) // 2, gran), gran)
        elif B > 1:
            # Batch blocking: amortize per-step grid overhead for tiny blocks,
            # but keep >= 2 batch tiles (v7x) and exact divisibility.
            step_bytes = c_pad * L * itemsize
            target = 1 << 20
            while (bt < B and (bt + 1) * step_bytes <= target
                   and (4 * (bt + 1) + 2) * c_pad * L * itemsize <= budget_bytes
                   and B >= 2 * (bt + 1) and B % (bt + 1) == 0):
                bt += 1
    return bt, lt


def _bias_add_impl(k_out, bias_ckk, *, alias_input):
    """out[b, c, y, x, kh, kw] = k_out[...] + bias_ckk[c, kh*K + kw]."""
    B, C, H, W, K, K2 = k_out.shape
    period = K * K2
    L = H * W * period
    x3 = k_out.reshape(B, C, L)                      # lane-dense flatten
    budget, limit = _vmem_budget_limit()
    bt, lt = _pick_bias_tiles(B, C, L, period, x3.dtype.itemsize, budget)
    # Period-aligned slab: every lane tile starts at a multiple of K*K, so a
    # single (C, Lt) slab is correct for all tiles and stays resident in VMEM.
    slab = jnp.tile(bias_ckk.astype(x3.dtype), (1, lt // period))
    grid = (pl.cdiv(L, lt), pl.cdiv(B, bt))
    out = pl.pallas_call(
        _bias_add_kernel,
        out_shape=jax.ShapeDtypeStruct((B, C, L), x3.dtype),
        grid_spec=pltpu.PrefetchScalarGridSpec(
            num_scalar_prefetch=0,
            grid=grid,
            in_specs=[
                pl.BlockSpec((bt, C, lt), lambda l, b: (b, 0, l)),
                # Constant index -> fetched once, resident for the whole kernel.
                # (Its default double buffer is accounted for in the budget.)
                pl.BlockSpec((C, lt), lambda l, b: (0, 0)),
            ],
            out_specs=pl.BlockSpec((bt, C, lt), lambda l, b: (b, 0, l)),
        ),
        input_output_aliases=({0: 0} if alias_input else {}),
        compiler_params=pltpu.CompilerParams(
            dimension_semantics=("parallel", "parallel"),
            vmem_limit_bytes=limit),
    )(x3, slab)
    return out.reshape(B, C, H, W, K, K2)


def _learnable_forward(k_out, rel_h, rel_w, *, alias_input):
    B, C, H, W, K, _ = k_out.shape
    C2 = C // 2
    # bias[c, kh*K+kw]: rel_h broadcasts over kw, rel_w over kh.
    bias_h = jnp.broadcast_to(rel_h.reshape(C2, K, 1), (C2, K, K))
    bias_w = jnp.broadcast_to(rel_w.reshape(C2, 1, K), (C2, K, K))
    bias_ckk = jnp.concatenate([bias_h, bias_w], 0).reshape(C, K * K)
    return _bias_add_impl(k_out, bias_ckk, alias_input=alias_input)


def _sine_forward(k_out, pe, *, heads, alias_input):
    # Net effect of the torch permute/view dance:
    #   out[b, h*Cg+c, y, x, kh, kw] = k_out[...] + pe[c, kh*K + kw]
    B, C, H, W, K, _ = k_out.shape
    bias_ckk = jnp.tile(pe[:, :K * K], (heads, 1))
    return _bias_add_impl(k_out, bias_ckk, alias_input=alias_input)


# ---------------------------------------------------------------------------
# Kernel 2: XLPositionalEncoding.key_position_conv (grouped 1x1 conv) as ONE
# full-depth matmul with a block-diagonal weight.
# ---------------------------------------------------------------------------
def _conv1x1_kernel(w_ref, x_ref, o_ref, *, compute_dtype):
    w = w_ref[...].astype(compute_dtype)
    x = x_ref[...].astype(compute_dtype)
    o_ref[...] = jnp.dot(w, x,
                         preferred_element_type=jnp.float32).astype(o_ref.dtype)


def _pick_s_tile(C, R, S, itemsize, budget_bytes):
    c_pad = _round_up(C, 8)
    r_pad = _round_up(R, 8)
    resident = 2 * c_pad * r_pad * itemsize          # resident weight (2 bufs)
    per_lane = 4 * (c_pad + r_pad) * itemsize        # x + out, double-buffered
    st = _round_down(max((budget_bytes - resident) // per_lane, 128), 128)
    if st >= S:
        if S >= 256:
            # v7x: keep >= 2 spatial tiles so both TensorCores get work.
            st = _round_up((S + 1) // 2, 128)
        else:
            st = S
    return st


def _xl_forward(r, w_bd, *, heads, compute_dtype):
    # r: (1, r_dim, Hr, Wr) -- the torch module's final view implies N == 1.
    _, r_dim, Hr, Wr = r.shape
    C = w_bd.shape[0]
    S = Hr * Wr
    x = r.reshape(r_dim, S)
    budget, limit = _vmem_budget_limit()
    # Keep the output lane dim a clean multiple of 128 -> unmasked stores.
    S_pad = S if S >= 128 else 128
    if S_pad != S:
        x = jnp.pad(x, ((0, 0), (0, S_pad - S)))
    st = _pick_s_tile(C, r_dim, S_pad, 4, budget)
    out = pl.pallas_call(
        functools.partial(_conv1x1_kernel, compute_dtype=compute_dtype),
        out_shape=jax.ShapeDtypeStruct((C, S_pad), jnp.float32),
        grid_spec=pltpu.PrefetchScalarGridSpec(
            num_scalar_prefetch=0,
            grid=(pl.cdiv(S_pad, st),),
            in_specs=[
                # Block-diagonal weight: tiny, constant index -> resident.
                pl.BlockSpec((C, r_dim), lambda s: (0, 0)),
                pl.BlockSpec((r_dim, st), lambda s: (0, s)),
            ],
            out_specs=pl.BlockSpec((C, st), lambda s: (0, s)),
        ),
        compiler_params=pltpu.CompilerParams(
            dimension_semantics=("parallel",),
            vmem_limit_bytes=limit),
    )(w_bd, x)
    if S_pad != S:
        out = out[:, :S]
    return out.reshape(1, heads, C // heads, 1, 1, S)


# ---------------------------------------------------------------------------
# Module wrapper (parameter setup + jit/donation glue).
# ---------------------------------------------------------------------------
class PositionalEncodingPallas:
    """Forward-pass (eval-mode) equivalent of the torch PositionalEncoding.

    With donate_k_out=True (default) the learnable/sine forward is jitted with
    k_out donated, so the bias add runs truly in place (the caller's k_out
    buffer is consumed).  Pass donate_k_out=False to keep the caller's buffer;
    the in-place alias is then dropped (avoids a hidden defensive copy).
    """

    def __init__(self, out_channels, kernel_size, heads, bias=False,
                 encoding='learnable', r_dim=256, key=None,
                 donate_k_out=True, xl_compute_dtype=jnp.bfloat16):
        self.out_channels = out_channels
        self.kernel_size = kernel_size
        self.heads = heads
        self.encoding = encoding
        if key is None:
            key = jax.random.PRNGKey(0)
        K = kernel_size
        donate = (0,) if donate_k_out else ()

        if encoding == 'learnable':
            kh, kw = jax.random.split(key)
            C2 = out_channels // 2
            self.rel_h = jax.random.normal(kh, (C2, 1, 1, K, 1), jnp.float32)
            self.rel_w = jax.random.normal(kw, (C2, 1, 1, 1, K), jnp.float32)
            self._fwd = jax.jit(
                functools.partial(_learnable_forward, alias_input=donate_k_out),
                donate_argnums=donate)
        elif encoding == 'sine':
            d_model = out_channels // heads
            max_len = 256
            position = jnp.arange(0, max_len, dtype=jnp.float32)
            div_term = jnp.exp(
                jnp.arange(0, d_model, 2, dtype=jnp.float32)
                * (-math.log(10000.0) / d_model))[:, None]
            pe = jnp.zeros((d_model, max_len), jnp.float32)
            pe = pe.at[0::2, :].set(jnp.sin(div_term * position))
            pe = pe.at[1::2, :].set(jnp.cos(div_term * position))
            self.pe = pe                                   # (d_model, max_len)
            # TODO(synk): nn.Dropout(p=0.1) is training-only; this kernel
            # implements the eval-mode forward (dropout == identity).
            self._fwd = jax.jit(
                functools.partial(_sine_forward, heads=heads,
                                  alias_input=donate_k_out),
                donate_argnums=donate)
        elif encoding == 'xl':
            assert not bias
            ku, kv, kw = jax.random.split(key, 3)
            Cg = out_channels // heads
            Rg = r_dim // heads
            self.u = jax.random.normal(ku, (1, heads, Cg, 1, 1, 1), jnp.float32)
            self.v = jax.random.normal(kv, (1, heads, Cg, 1, 1, 1), jnp.float32)
            # Conv2d(r_dim, out_channels, 1, groups=heads, bias=False) weight
            # (synthetic deterministic init, not torch's kaiming uniform).
            self.conv_w = 0.05 * jax.random.normal(
                kw, (out_channels, Rg, 1, 1), jnp.float32)
            # Block-diagonal (C, r_dim) weight for the single full-depth matmul.
            w_hcr = self.conv_w.reshape(heads, Cg, Rg)
            eye = jnp.eye(heads, dtype=jnp.float32)
            self._w_bd = jnp.einsum('hcr,hg->hcgr', w_hcr,
                                    eye).reshape(out_channels, heads * Rg)
            self._fwd = jax.jit(
                functools.partial(_xl_forward, heads=heads,
                                  compute_dtype=xl_compute_dtype))
        else:
            raise NotImplementedError

    def __call__(self, k_out, r=None):
        if self.encoding == 'learnable':
            return self._fwd(k_out, self.rel_h, self.rel_w)
        elif self.encoding == 'sine':
            return self._fwd(k_out, self.pe)
        elif self.encoding == 'xl':
            r_out = self._fwd(r, self._w_bd)
            return (k_out, r_out, self.u, self.v)
        raise NotImplementedError


# ---------------------------------------------------------------------------
# Pure-JAX references (direct transliteration of the torch forward).
# ---------------------------------------------------------------------------
def _learnable_ref(k_out, rel_h, rel_w):
    C = k_out.shape[1]
    return jnp.concatenate(
        [k_out[:, :C // 2] + rel_h[None], k_out[:, C // 2:] + rel_w[None]],
        axis=1)


def _sine_ref(k_out, pe, heads):
    B, C, H, W, K, _ = k_out.shape
    Cg = C // heads
    x = k_out.reshape(B, heads, Cg, H, W, K * K)
    x = jnp.transpose(x, (0, 1, 3, 4, 2, 5)).reshape(-1, Cg, K * K)
    x = x + pe[:, :K * K][None]
    x = x.reshape(B, heads, H, W, Cg, K * K)
    x = jnp.transpose(x, (0, 1, 4, 2, 3, 5))
    return x.reshape(B, C, H, W, K, K)


def _xl_ref(r, conv_w, heads, out_channels):
    out = jax.lax.conv_general_dilated(
        r, conv_w, window_strides=(1, 1), padding='VALID',
        dimension_numbers=('NCHW', 'OIHW', 'NCHW'),
        feature_group_count=heads)
    return out.reshape(1, heads, out_channels // heads, 1, 1, -1)


if __name__ == "__main__":
    key = jax.random.PRNGKey(0)
    k1, k2, k3, k4, k5 = jax.random.split(key, 5)

    B, C, H, W, K = 2, 4, 4, 4, 3
    heads = 2
    r_dim = 8

    k_out = jax.random.normal(k1, (B, C, H, W, K, K), jnp.float32)
    r = jax.random.normal(k2, (1, r_dim, H, W), jnp.float32)

    # --- learnable (default encoding) ---
    enc_l = PositionalEncodingPallas(C, K, heads, encoding='learnable', key=k3)
    ref_l = _learnable_ref(k_out, enc_l.rel_h, enc_l.rel_w)
    out_l = jax.block_until_ready(enc_l(jnp.copy(k_out)))   # donated copy
    np.testing.assert_allclose(np.asarray(out_l), np.asarray(ref_l),
                               rtol=1e-6, atol=1e-6)

    # --- sine ---
    enc_s = PositionalEncodingPallas(C, K, heads, encoding='sine', key=k4)
    ref_s = _sine_ref(k_out, enc_s.pe, heads)
    out_s = jax.block_until_ready(enc_s(jnp.copy(k_out)))   # donated copy
    np.testing.assert_allclose(np.asarray(out_s), np.asarray(ref_s),
                               rtol=1e-6, atol=1e-6)

    # --- xl ---
    enc_x = PositionalEncodingPallas(C, K, heads, encoding='xl',
                                     r_dim=r_dim, key=k5)
    _, r_out, u, v = enc_x(k_out, r)
    r_out = jax.block_until_ready(r_out)
    ref_r = _xl_ref(r, enc_x.conv_w, heads, C)
    # bf16 MXU operands (f32 accumulation) -> looser tolerance vs the f32 ref.
    np.testing.assert_allclose(np.asarray(r_out), np.asarray(ref_r),
                               rtol=2e-2, atol=2e-2)

    print("KERNEL_OK")
</pallas_src>

<mosaic_0001>
module attributes {stable_mosaic.version = 11 : i64} {
  func.func @_bias_add_kernel(%arg0: i32, %arg1: i32, %arg2: memref<1x4x144xf32, #tpu.memory_space<vmem>>, %arg3: memref<4x144xf32, #tpu.memory_space<vmem>>, %arg4: memref<1x4x144xf32, #tpu.memory_space<vmem>>) attributes {dimension_semantics = [#tpu.dimension_semantics<parallel>, #tpu.dimension_semantics<parallel>], iteration_bounds = array<i64: 1, 2>, scalar_prefetch = 0 : i64, scratch_operands = 0 : i64, tpu.core_type = #tpu.core_type<tc>, window_params = [{transform_indices = @transform_0, window_bounds = array<i64: 1, 4, 144>}, {pipeline_mode = #tpu.pipeline_mode<synchronous>, transform_indices = @transform_1, window_bounds = array<i64: 4, 144>}, {transform_indices = @transform_2, window_bounds = array<i64: 1, 4, 144>}]} {
    %c0 = arith.constant 0 : index
    %c0_0 = arith.constant 0 : index
    %c0_1 = arith.constant 0 : index
    %0 = vector.load %arg2[%c0, %c0_0, %c0_1] : memref<1x4x144xf32, #tpu.memory_space<vmem>>, vector<1x4x144xf32>
    %c0_2 = arith.constant 0 : index
    %c0_3 = arith.constant 0 : index
    %1 = vector.load %arg3[%c0_2, %c0_3] : memref<4x144xf32, #tpu.memory_space<vmem>>, vector<4x144xf32>
    %2 = vector.shape_cast %1 : vector<4x144xf32> to vector<1x4x144xf32>
    %3 = arith.addf %0, %2 : vector<1x4x144xf32>
    %c0_4 = arith.constant 0 : index
    %c0_5 = arith.constant 0 : index
    %c0_6 = arith.constant 0 : index
    %4 = vector.load %arg4[%c0_4, %c0_5, %c0_6] : memref<1x4x144xf32, #tpu.memory_space<vmem>>, vector<1x4x144xf32>
    tpu.vector_store %arg4[%c0_4, %c0_5, %c0_6], %3 {strides = array<i32>} : memref<1x4x144xf32, #tpu.memory_space<vmem>>, vector<1x4x144xf32>,
    return
  }
  func.func @transform_0(%arg0: i32, %arg1: i32) -> (i32, i32, i32) {
    %c0_i32 = arith.constant 0 : i32
    %c0_i32_0 = arith.constant 0 : i32
    return %arg1, %c0_i32, %arg0 : i32, i32, i32
  }
  func.func @transform_1(%arg0: i32, %arg1: i32) -> (i32, i32) {
    %c0_i32 = arith.constant 0 : i32
    %c0_i32_0 = arith.constant 0 : i32
    %c0_i32_1 = arith.constant 0 : i32
    return %c0_i32, %c0_i32_0 : i32, i32
  }
  func.func @transform_2(%arg0: i32, %arg1: i32) -> (i32, i32, i32) {
    %c0_i32 = arith.constant 0 : i32
    %c0_i32_0 = arith.constant 0 : i32
    return %arg1, %c0_i32, %arg0 : i32, i32, i32
  }
}

</mosaic_0001>

<bundles_post_ra>
// kernel: tile.7
= control target key start
LH: loop header
LB: loop body
LE: loop exit
PB: predicated region body
PF: predicated region fallthrough
CT: control target
= control target key end

     0   :  { %vm6_vm0 = vcmask 1043458   ;;  %s36_s6 = smov 3  ;;  %s39_s7 = smov 12  ;;  %vm26_vm1 = vcmask 15360   ;;  %vm8_vm2 = vcmask 72704   ;;  %vm30_vm3 = vcmask 56320   ;;  %s413_s0 = inlined_call_operand.vmem [shape: f32[4,16,9], index: 0, kind: input, shape index: {}]   ;;  %s414_s1 = inlined_call_operand.vmem [shape: f32[4,144], index: 1, kind: output, shape index: {}]  }
   0x1   :  { %v219_v0 = vld [vmem:[%s413_s0 + $0xd] ss:$16 sm:%s36_s6]   ;;  %s48_s12 = smov 3  ;;  %s51_s15 = smov 12  ;;  %vm33_vm4 = vcmask 1048560   ;;  %vm45_vm5 = vcmask 1032104  }
   0x2   :  { %v220_v1 = vld [vmem:[%s413_s0 + $0xd] ss:$16 sm:%s39_s7]   ;;  %v221_v3 = vld [vmem:[%s413_s0 + $0xc] ss:$16 sm:%s48_s12]   ;;  %s263_s16 = smov 117   ;;  %s11_s19 = smov 3 }
   0x3   :  { %v42_v2 = vsel %vm6_vm0, %v220_v1, %v219_v0  ;;  %v222_v4 = vld [vmem:[%s413_s0 + $0xc] ss:$16 sm:%s51_s15]   ;;  %s14_s20 = smov 12  ;;  %v215_v6 = vld [vmem:[%s413_s0 + $0xe] ss:$16 sm:%s11_s19]   ;;  %s19_s25 = smov 3 }
   0x4   :  { %43 = vrot.lane.b32.xlu0 %v42_v2, %s263_s16  ;;  %v54_v5 = vsel %vm6_vm0, %v222_v4, %v221_v3  ;;  %v216_v7 = vld [vmem:[%s413_s0 + $0xe] ss:$16 sm:%s14_s20]   ;;  %s22_s26 = smov 12  ;;  %s264_s27 = smov 108   ;;  %vm57_vm6 = vcmask 958304   ;;  %vm69_vm7 = vcmask 884504  }
   0x5   :  { %55 = vrot.lane.b32.xlu1 %v54_v5, %s264_s27  ;;  %v17_v8 = vsel %vm6_vm0, %v216_v7, %v215_v6  ;;  %v217_v9 = vld [vmem:[%s413_s0 + $0xe] ss:$16 sm:%s19_s25]   ;;  %s60_s30 = smov 3  ;;  %s63_s6 = smov 12  ;;  %vm81_vm8 = vcmask 810704   ;;  %vm93_vm9 = vcmask 736904  }
   0x6   :  { %v218_v10 = vld [vmem:[%s413_s0 + $0xe] ss:$16 sm:%s22_s26]   ;;  %v223_v11 = vld [vmem:[%s413_s0 + $0xb] ss:$16 sm:%s60_s30]   ;;  %s72_s9 = smov 3  ;;  %s75_s10 = smov 12 }
   0x7   :  { %v25_v12 = vsel %vm6_vm0, %v218_v10, %v217_v9  ;;  %v224_v13 = vld [vmem:[%s413_s0 + $0xb] ss:$16 sm:%s63_s6]   ;;  %v225_v16 = vld [vmem:[%s413_s0 + $0xa] ss:$16 sm:%s72_s9]   ;;  %s84_s15 = smov 3  ;;  %s265_s16 = smov 126  }
   0x8   :  { %v27_v14 = vsel %vm26_vm1, %v25_v12, %v17_v8  ;;  %v66_v15 = vsel %vm6_vm0, %v224_v13, %v223_v11  ;;  %v226_v17 = vld [vmem:[%s413_s0 + $0xa] ss:$16 sm:%s75_s10]   ;;  %s266_s17 = smov 99   ;;  %v227_v18 = vld [vmem:[%s413_s0 + $0x9] ss:$16 sm:%s84_s15]   ;;  %s87_s20 = smov 12 }
   0x9   :  { %28 = vrot.lane.b32.xlu0 %v27_v14, %s265_s16  ;;  %67 = vrot.lane.b32.xlu1 %v66_v15, %s266_s17  ;;  %v78_v19 = vsel %vm6_vm0, %v226_v17, %v225_v16  ;;  %v228_v20 = vld [vmem:[%s413_s0 + $0x9] ss:$16 sm:%s87_s20]   ;;  %s96_s23 = smov 3  ;;  %s99_s24 = smov 12  ;;  %vm105_vm10 = vcmask 663104   ;;  %vm117_vm11 = vcmask 589304  }
   0xa   :  { %v90_v21 = vsel %vm6_vm0, %v228_v20, %v227_v18  ;;  %v229_v22 = vld [vmem:[%s413_s0 + $0x8] ss:$16 sm:%s96_s23]   ;;  %s108_s29 = smov 3  ;;  %s111_s3 = smov 12  ;;  %vm129_vm12 = vcmask 515504   ;;  %vm141_vm13 = vcmask 441704  }
   0xb   :  { %v230_v23 = vld [vmem:[%s413_s0 + $0x8] ss:$16 sm:%s99_s24]   ;;  %v231_v24 = vld [vmem:[%s413_s0 + $0x7] ss:$16 sm:%s108_s29]   ;;  %s267_s4 = smov 90   ;;  %s268_s5 = smov 81  }
   0xc   :  { %v232_v25 = vld [vmem:[%s413_s0 + $0x7] ss:$16 sm:%s111_s3]   ;;  %s120_s8 = smov 3  ;;  %s123_s9 = smov 12  ;;  %v102_v26 = vsel %vm6_vm0, %v230_v23, %v229_v22  ;;  %vm153_vm14 = vcmask 367904   ;;  %vm165_vm15 = vcmask 294104  }
   0xd   :  { %79 = vrot.lane.b32.xlu0 %v78_v19, %s267_s4  ;;  %91 = vrot.lane.b32.xlu1 %v90_v21, %s268_s5  ;;  %v114_v27 = vsel %vm6_vm0, %v232_v25, %v231_v24  ;;  %v233_v28 = vld [vmem:[%s413_s0 + $0x6] ss:$16 sm:%s120_s8]   ;;  %s132_s12 = smov 3  ;;  %s135_s17 = smov 12  ;;  %vm189_vm1 = vcmask 146504  }
   0xe   :  { %v234_v29 = vld [vmem:[%s413_s0 + $0x6] ss:$16 sm:%s123_s9]   ;;  %v235_v30 = vld [vmem:[%s413_s0 + $0x5] ss:$16 sm:%s132_s12]   ;;  %s144_s20 = smov 3  ;;  %s147_s21 = smov 12 }
   0xf   :  { %v236_v31 = vld [vmem:[%s413_s0 + $0x5] ss:$16 sm:%s135_s17]   ;;  %s269_s22 = smov 72   ;;  %s270_s23 = smov 63   ;;  %v126_v32 = vsel %vm6_vm0, %v234_v29, %v233_v28  ;;  %v237_v34 = vld [vmem:[%s413_s0 + $0x4] ss:$16 sm:%s144_s20]  }
  0x10   :  { %s156_s24 = smov 3  ;;  %v138_v33 = vsel %vm6_vm0, %v236_v31, %v235_v30  ;;  %v238_v35 = vld [vmem:[%s413_s0 + $0x4] ss:$16 sm:%s147_s21]   ;;  %s159_s29 = smov 12 }
  0x11   :  { %103 = vrot.lane.b32.xlu0 %v102_v26, %s269_s22  ;;  %115 = vrot.lane.b32.xlu1 %v114_v27, %s270_s23  ;;  %v239_v36 = vld [vmem:[%s413_s0 + $0x3] ss:$16 sm:%s156_s24]   ;;  %s168_s5 = smov 3  ;;  %s171_s6 = smov 12  ;;  %v150_v38 = vsel %vm6_vm0, %v238_v35, %v237_v34 }
  0x12   :  { %v240_v37 = vld [vmem:[%s413_s0 + $0x3] ss:$16 sm:%s159_s29]   ;;  %s180_s7 = smov 3  ;;  %s271_s8 = smov 54   ;;  %v241_v40 = vld [vmem:[%s413_s0 + $0x2] ss:$16 sm:%s168_s5]  }
  0x13   :  { %s272_s9 = smov 45   ;;  %s183_s10 = smov 12  ;;  %v162_v39 = vsel %vm6_vm0, %v240_v37, %v239_v36  ;;  %v242_v41 = vld [vmem:[%s413_s0 + $0x2] ss:$16 sm:%s171_s6]   ;;  %v243_v42 = vld [vmem:[%s413_s0 + $0x1] ss:$16 sm:%s180_s7]  }
  0x14   :  { %v244_v43 = vld [vmem:[%s413_s0 + $0x1] ss:$16 sm:%s183_s10]   ;;  %s192_s19 = smov 3  ;;  %s2_s20 = smov 3  ;;  %v174_v46 = vsel %vm6_vm0, %v242_v41, %v241_v40 }
  0x15   :  { %127 = vrot.lane.b32.xlu0 %v126_v32, %s271_s8  ;;  %139 = vrot.lane.b32.xlu1 %v138_v33, %s272_s9  ;;  %s195_s21 = smov 12  ;;  %v3_v44 = vld [vmem:[%s413_s0] ss:$16 sm:%s2_s20]   ;;  %s4_s24 = smov 12  ;;  %v186_v47 = vsel %vm6_vm0, %v244_v43, %v243_v42 }
  0x16   :  { %s273_s25 = smov 36   ;;  %s274_s26 = smov 27   ;;  %v5_v45 = vld [vmem:[%s413_s0] ss:$16 sm:%s4_s24]   ;;  %v245_v49 = vld [vmem:[%s413_s0 + $0xf] ss:$16 sm:%s192_s19]  }
  0x17   :  { %v7_v48 = vsel %vm6_vm0, %v5_v45, %v3_v44  ;;  %v246_v50 = vld [vmem:[%s413_s0 + $0xf] ss:$16 sm:%s195_s21]   ;;  %s275_s0 = smov 18   ;;  %s276_s4 = smov 9  }
  0x18   :  { %9 = vst.msk [vmem:[#allocation0] sm:$0xf] %vm8_vm2, %v7_v48   ;;  %v198_v51 = vsel %vm6_vm0, %v246_v50, %v245_v49  ;;  %s277_s5 = smov 7   ;;  %vm177_vm0 = vcmask 220304   ;;  %vm201_vm2 = vcmask 130104  }
  0x19   :  { %151 = vrot.lane.b32.xlu0 %v150_v38, %s273_s25  ;;  %163 = vrot.lane.b32.xlu1 %v162_v39, %s274_s26 }
  0x1d   :  { %175 = vrot.lane.b32.xlu0 %v174_v46, %s275_s0  ;;  %187 = vrot.lane.b32.xlu1 %v186_v47, %s276_s4 }
  0x21   :  { %199 = vrot.lane.b32.xlu0 %v198_v51, %s277_s5 }
  0x76   :  { %v44_v52 = vpop.permute.xlu0 %43  }
  0x77   :  { %v56_v53 = vpop.permute.xlu1 %55  }
  0x7b   :  { %v29_v54 = vpop.permute.xlu0 %28   ;;  %v68_v55 = vpop.permute.xlu1 %67  }
  0x7c   :  { %32 = vst.msk [vmem:[#allocation0 + $0x8] sm:$0xf] %vm30_vm3, %v29_v54  }
  0x7d   :  { %34 = vst.msk [vmem:[#allocation0] sm:$0xf] %vm33_vm4, %v29_v54  }
  0x7e   :  { %46 = vst.msk [vmem:[#allocation0] sm:$0xf] %vm45_vm5, %v44_v52  }
  0x7f   :  { %58 = vst.msk [vmem:[#allocation0] sm:$0xf] %vm57_vm6, %v56_v53   ;;  %v80_v56 = vpop.permute.xlu0 %79   ;;  %v92_v57 = vpop.permute.xlu1 %91  }
  0x80   :  { %70 = vst.msk [vmem:[#allocation0] sm:$0xf] %vm69_vm7, %v68_v55  }
  0x81   :  { %82 = vst.msk [vmem:[#allocation0] sm:$0xf] %vm81_vm8, %v80_v56  }
  0x82   :  { %94 = vst.msk [vmem:[#allocation0] sm:$0xf] %vm93_vm9, %v92_v57  }
  0x83   :  { %v104_v58 = vpop.permute.xlu0 %103   ;;  %v116_v59 = vpop.permute.xlu1 %115  }
  0x84   :  { %106 = vst.msk [vmem:[#allocation0] sm:$0xf] %vm105_vm10, %v104_v58  }
  0x85   :  { %118 = vst.msk [vmem:[#allocation0] sm:$0xf] %vm117_vm11, %v116_v59  }
  0x87   :  { %v128_v60 = vpop.permute.xlu0 %127   ;;  %v140_v61 = vpop.permute.xlu1 %139  }
  0x88   :  { %130 = vst.msk [vmem:[#allocation0] sm:$0xf] %vm129_vm12, %v128_v60  }
  0x89   :  { %142 = vst.msk [vmem:[#allocation0] sm:$0xf] %vm141_vm13, %v140_v61  }
  0x8b   :  { %v152_v62 = vpop.permute.xlu0 %151   ;;  %v164_v63 = vpop.permute.xlu1 %163  }
  0x8c   :  { %154 = vst.msk [vmem:[#allocation0] sm:$0xf] %vm153_vm14, %v152_v62  }
  0x8d   :  { %166 = vst.msk [vmem:[#allocation0] sm:$0xf] %vm165_vm15, %v164_v63  }
  0x8f   :  { %v176_v0 = vpop.permute.xlu0 %175   ;;  %v188_v1 = vpop.permute.xlu1 %187  }
  0x90   :  { %178 = vst.msk [vmem:[#allocation0] sm:$0xf] %vm177_vm0, %v176_v0  }
  0x91   :  { %190 = vst.msk [vmem:[#allocation0] sm:$0xf] %vm189_vm1, %v188_v1  }
  0x93   :  { %v200_v2 = vpop.permute.xlu0 %199  }
  0x94   :  { %203 = vst.msk [vmem:[#allocation0 + $0x8] sm:$0xf] %vm201_vm2, %v200_v2  }
  0x98   :  { %v207_v3 = vld [vmem:[#allocation0] sm:$0xf] }
  0x99   :  { %209 = vst [vmem:[%s414_s1] sm:$0xf] %v207_v3 }
  0x9b   :  { %v211_v4 = vld [vmem:[#allocation0 + $0x8] sm:$0xf] }
  0x9c   :  { %247 = vst [vmem:[%s414_s1 + $0x4] sm:$0xf] %v211_v4 }

// kernel: _learnable_forward.1
= control target key start
LH: loop header
LB: loop body
LE: loop exit
PB: predicated region body
PF: predicated region fallthrough
CT: control target
= control target key end

     0   :  { %s353_s9 = smov 0   ;;  %s355_s10 = smov 0   ;;  %s377_s0 = inlined_call_operand.vmem [shape: f32[2,4,144], index: 0, kind: input, shape index: {}, may-alias: {0,2}]   ;;  %s378_s1 = inlined_call_operand.vmem [shape: f32[4,144], index: 1, kind: input, shape index: {}]   ;;  %s379_s2 = inlined_call_operand.vmem [shape: f32[2,4,144], index: 2, kind: output, shape index: {}, may-alias: {0,2}]  }
   0x1   :  { %s357_s11 = smov 0  }
   0x2 LB: > { %s21_s12 = sadd.s32 1, %s332_s10  ;;  %p281_p0 = scmp.ge.s32.totalorder %s336_s11, 1  ;;  %s336_s11 = sphi %s357_s11, %s12_s11   ;;  %s332_s10 = sphi %s355_s10, %s381_s10   ;;  %s328_s9 = sphi %s353_s9, %s380_s9  }
   0x3   : > { %p22_p1 = scmp.ge.s32.totalorder %s21_s12, 2  ;;  %p133_p2 = scmp.lt.s32.totalorder %s336_s11, 3 }
   0x5   : > { %s383_s12 = smov (%p22_p1, %s21_s12), 0  ;;  %p134_p3 = pnand %p281_p0, %p133_p2 }
   0x6   : > { %p164_p4 = scmp.lt.s32.totalorder (!%p134_p3), %s328_s9, 1  ;;  %vm186_vm0 = vcmask (!%p134_p3), 1043456   ;;  %vm187_vm1 = vcmask (!%p134_p3), 130052   ;;  %v184_v0 = vld [vmem:[%s378_s1] sm:$0xff] (!%p134_p3) }
   0x7   : > { %137 = sbr.rel (%p134_p3) target bundleno = 21 (0x15), region = 28  ;;  %vm188_vm2 = vmor (!%p134_p3), %vm187_vm1, %vm186_vm0 }
   0xe   : > { %s385_s9 = smov (!%p164_p4, %s328_s9), 1 }
   0xf   : > { %s288_s13 = sshll.u32 %s385_s9, 3 }
  0x10   : > { %s171_s18 = scalar_lea.vmem %s377_s0, %s288_s13  ;;  %s181_s21 = scalar_lea.vmem %s379_s2, %s288_s13 }
  0x11   : > { %v183_v1 = vld [vmem:[%s171_s18] sm:$0xff] }
  0x12   : > { %v185_v2 = vadd.f32 %v184_v0, %v183_v1 }
  0x14   : > { %189 = vst.msk [vmem:[%s181_s21] sm:$0xff] %vm188_vm2, %v185_v2 }
  0x15 PF: > { %s12_s11 = sadd.s32 1, %s336_s11   ;;  %s380_s9 = smov %s332_s10 }
  0x16   : > { %p9_p5 = scmp.ge.s32.totalorder %s12_s11, 4   ;;  %s381_s10 = smov %s383_s12 }
  0x18   :  { %11 = sbr.rel (!%p9_p5) target bundleno = 2 (0x2), region = 58 }

</bundles_post_ra>
